<compile_context>
chip_gen: v6e
topology: v6e:2x2x1
jax: 0.10.0
libtpu: 0.0.40
codegen_flags: <defaults>
</compile_context>

<pallas_src>
import functools

import jax
import jax.numpy as jnp
from jax import lax
from jax.experimental import pallas as pl
from jax.experimental.pallas import tpu as pltpu

_LANE = 128
_MAX_TILE_ROWS = 8192                 # 8192 x 128 f32 = 4 MiB per buffer
_VMEM_CAP_BYTES = 40 * 1024 * 1024    # explicit scoped-VMEM request ceiling


def _softplus(x):
    # Numerically stable softplus: exactly 1 exp + 1 log1p per element.
    return jnp.maximum(x, 0.0) + jnp.log1p(jnp.exp(-jnp.abs(x)))


@functools.lru_cache(maxsize=1)
def _num_tensorcores():
    """Best-effort TensorCores-per-device count (v7x / megacore -> 2)."""
    n = 1
    try:
        dev = jax.devices()[0]
        for attr in ("num_cores", "core_count"):
            v = getattr(dev, attr, None)
            if isinstance(v, int) and v > 0:
                n = max(n, v)
    except Exception:
        pass
    try:
        info = pltpu.get_tpu_info()
        for attr in ("num_cores", "core_count", "num_tensorcores",
                     "tensorcores_per_chip"):
            v = getattr(info, attr, None)
            if isinstance(v, int) and v > 0:
                n = max(n, v)
    except Exception:
        pass
    return max(1, min(n, 2))


def _row_granularity(*arrays):
    """Sublane granularity for the block's second-minor dim (8 f32 / 16 bf16)."""
    g = 8
    for a in arrays:
        itemsize = jnp.dtype(jnp.result_type(a)).itemsize
        g = max(g, 8 * max(1, 4 // max(1, itemsize)))
    return g


# ---------------------------------------------------------------------------
# Kernel
# ---------------------------------------------------------------------------

def _make_sum_kernel(compute_sp, n_inputs, *, tile_rows, rows, blocks_per_core,
                     total_blocks, needs_mask):
    """Kernel accumulating sum(compute_sp(inputs)) over the first `rows` rows."""
    ragged = total_blocks * tile_rows > rows
    first_edge = (total_blocks - 1) if ragged else total_blocks
    folds = tile_rows // 8

    def _fold(x):
        # (tile_rows,128) -> (8,128): free sublane-split reshape + VALU adds.
        if folds > 1:
            x = jnp.sum(x.reshape(folds, 8, _LANE), axis=0)
        return x

    def kernel(*refs):
        in_refs = refs[:n_inputs]
        o_ref = refs[n_inputs]
        acc_ref = refs[n_inputs + 1]

        i = pl.program_id(0)          # core (parallel) axis
        j = pl.program_id(1)          # reduction (arbitrary) axis
        blk = i * blocks_per_core + j  # linear block index

        @pl.when(j == 0)
        def _():
            acc_ref[...] = jnp.zeros_like(acc_ref)

        sp = compute_sp(*in_refs)     # (tile_rows, 128) f32

        def _masked_add():
            row = lax.broadcasted_iota(jnp.int32, sp.shape, 0) + blk * tile_rows
            acc_ref[...] += _fold(jnp.where(row < rows, sp, 0.0))

        if not needs_mask:
            acc_ref[...] += _fold(sp)
        elif first_edge <= 0:
            _masked_add()             # single (partial) block
        else:
            # Only the last real block and phantom blocks of the core split
            # can be partial; keep the steady-state loop mask-free.
            @pl.when(blk < first_edge)
            def _():
                acc_ref[...] += _fold(sp)

            @pl.when(blk >= first_edge)
            def _():
                _masked_add()

        @pl.when(j == blocks_per_core - 1)
        def _():
            o_ref[0, 0] = jnp.sum(acc_ref[...])

    return kernel


def _sp_single(negate):
    def f(x_ref):
        x = x_ref[...].astype(jnp.float32)
        return _softplus(-x if negate else x)
    return f


def _sp_fused_d(real_ref, fake_ref):
    return (_softplus(-real_ref[...].astype(jnp.float32))
            + _softplus(fake_ref[...].astype(jnp.float32)))


# ---------------------------------------------------------------------------
# Launcher
# ---------------------------------------------------------------------------

def _launch_sum(compute_sp, inputs, rows):
    """Returns sum over all `rows` x 128 elements of compute_sp(inputs)."""
    gran = _row_granularity(*inputs)
    tile_rows = max(gran, min(_MAX_TILE_ROWS, (rows // gran) * gran))
    total_blocks = pl.cdiv(rows, tile_rows)

    # Leading "parallel" axis: split the blocks across the TensorCores of the
    # device (2x on v7x / megacore).  On 1-core parts only enable the split
    # when it adds no phantom step (even block count) or when we positively
    # detected >= 2 cores.
    cores = 1
    if total_blocks >= 2 and (_num_tensorcores() >= 2 or total_blocks % 2 == 0):
        cores = 2
    blocks_per_core = pl.cdiv(total_blocks, cores)

    phantom = cores * blocks_per_core > total_blocks
    ragged = total_blocks * tile_rows > rows
    needs_mask = phantom or ragged

    if phantom:
        def in_map(i, j):
            return (jnp.minimum(i * blocks_per_core + j, total_blocks - 1), 0)
    else:
        def in_map(i, j):
            return (i * blocks_per_core + j, 0)

    kernel = _make_sum_kernel(
        compute_sp, len(inputs), tile_rows=tile_rows, rows=rows,
        blocks_per_core=blocks_per_core, total_blocks=total_blocks,
        needs_mask=needs_mask)

    block_bytes = tile_rows * _LANE * sum(
        jnp.dtype(x.dtype).itemsize for x in inputs)
    vmem_limit = int(min(_VMEM_CAP_BYTES,
                         max(16 * 1024 * 1024, 3 * block_bytes + (2 << 20))))

    partials = pl.pallas_call(
        kernel,
        out_shape=jax.ShapeDtypeStruct((cores, 1), jnp.float32),
        grid_spec=pltpu.PrefetchScalarGridSpec(
            num_scalar_prefetch=0,
            grid=(cores, blocks_per_core),
            in_specs=[pl.BlockSpec((tile_rows, _LANE), in_map)
                      for _ in inputs],
            out_specs=pl.BlockSpec((1, 1), lambda i, j: (i, 0),
                                   memory_space=pltpu.SMEM),
            scratch_shapes=[pltpu.VMEM((8, _LANE), jnp.float32)],
        ),
        compiler_params=pltpu.CompilerParams(
            dimension_semantics=("parallel", "arbitrary"),
            vmem_limit_bytes=vmem_limit),
    )(*inputs)
    return jnp.sum(partials)


# ---------------------------------------------------------------------------
# Wrappers
# ---------------------------------------------------------------------------

def _split_flat(x):
    """Flatten; return (lane-dense (rows,128) main slab, <128-elem tail, n, rows).

    Aligned sizes are a free bitcast reshape (no copy, no pad); ragged sizes
    hand the aligned prefix to the kernel and the tiny remainder to XLA.
    """
    xf = jnp.asarray(x).reshape(-1)
    n = int(xf.shape[0])
    rows = n // _LANE
    n_main = rows * _LANE
    if rows == 0:
        return None, xf, n, 0
    if n_main == n:
        return xf.reshape(rows, _LANE), None, n, rows
    return xf[:n_main].reshape(rows, _LANE), xf[n_main:], n, rows


def _softplus_mean(x, negate):
    main, tail, n, rows = _split_flat(x)
    gran = _row_granularity(x)
    total = jnp.float32(0.0)
    if main is not None:
        if rows >= gran:
            total = _launch_sum(_sp_single(negate), (main,), rows)
        else:
            t = main.astype(jnp.float32)
            total = jnp.sum(_softplus(-t if negate else t))
    if tail is not None:
        t = tail.astype(jnp.float32)
        total = total + jnp.sum(_softplus(-t if negate else t))
    return total / jnp.float32(n)


def _fused_d_loss(real, fake):
    r_main, r_tail, n, rows = _split_flat(real)
    f_main, f_tail, _, _ = _split_flat(fake)
    gran = _row_granularity(real, fake)
    total = jnp.float32(0.0)
    if r_main is not None:
        if rows >= gran:
            total = _launch_sum(_sp_fused_d, (r_main, f_main), rows)
        else:
            total = (jnp.sum(_softplus(-r_main.astype(jnp.float32)))
                     + jnp.sum(_softplus(f_main.astype(jnp.float32))))
    if r_tail is not None:
        total = (total
                 + jnp.sum(_softplus(-r_tail.astype(jnp.float32)))
                 + jnp.sum(_softplus(f_tail.astype(jnp.float32))))
    return total / jnp.float32(n)


def gan_logistic_loss(list_pred, mode):
    """Forward pass of GANLogisticLoss."""
    if mode == "D":
        assert len(list_pred) == 2
        real, fake = list_pred
        if jnp.shape(real) == jnp.shape(fake):
            # softplus(-real).mean() + softplus(fake).mean(): one kernel,
            # one shared accumulator, one division (valid since same n).
            return _fused_d_loss(real, fake)
        # Fallback for differing logit shapes: two separate reductions.
        return _softplus_mean(real, True) + _softplus_mean(fake, False)
    elif mode == "G":
        assert len(list_pred) == 1
        return _softplus_mean(list_pred[0], True)
    raise ValueError("This is a unknown mode of {}".format(mode))


def _reference(list_pred, mode):
    sp = lambda v: jnp.maximum(v, 0.0) + jnp.log1p(jnp.exp(-jnp.abs(v)))
    if mode == "D":
        return (jnp.mean(sp(-jnp.asarray(list_pred[0], jnp.float32)))
                + jnp.mean(sp(jnp.asarray(list_pred[1], jnp.float32))))
    return jnp.mean(sp(-jnp.asarray(list_pred[0], jnp.float32)))


if __name__ == "__main__":
    key = jax.random.PRNGKey(0)
    k_real, k_fake, k_odd = jax.random.split(key, 3)

    # Patch-GAN style discriminator logits, NCHW.
    real_pred = jax.random.normal(k_real, (2, 4, 16, 16), dtype=jnp.float32)
    fake_pred = jax.random.normal(k_fake, (2, 4, 16, 16), dtype=jnp.float32)

    # mode 'D' (fused single-kernel path, aligned element count -> zero-copy)
    d_loss = jax.block_until_ready(gan_logistic_loss([real_pred, fake_pred], "D"))
    d_ref = _reference([real_pred, fake_pred], "D")
    assert jnp.allclose(d_loss, d_ref, rtol=1e-5, atol=1e-5), (d_loss, d_ref)

    # mode 'G'
    g_loss = jax.block_until_ready(gan_logistic_loss([fake_pred], "G"))
    g_ref = _reference([fake_pred], "G")
    assert jnp.allclose(g_loss, g_ref, rtol=1e-5, atol=1e-5), (g_loss, g_ref)

    # Ragged element count (2*3*15*15 = 1350): aligned prefix (10 x 128) goes
    # through the kernel (2 blocks -> exercises the parallel split + the
    # partial-block row mask); the 70-element remainder is reduced in XLA.
    odd_pred = jax.random.normal(k_odd, (2, 3, 15, 15), dtype=jnp.float32)
    g2_loss = jax.block_until_ready(gan_logistic_loss([odd_pred], "G"))
    g2_ref = _reference([odd_pred], "G")
    assert jnp.allclose(g2_loss, g2_ref, rtol=1e-5, atol=1e-5), (g2_loss, g2_ref)

    # bf16 logits: dtype is kept on the way into the kernel (halves HBM reads);
    # the f32 upcast happens in-kernel.
    real_bf16 = real_pred.astype(jnp.bfloat16)
    fake_bf16 = fake_pred.astype(jnp.bfloat16)
    d16_loss = jax.block_until_ready(
        gan_logistic_loss([real_bf16, fake_bf16], "D"))
    d16_ref = _reference([real_bf16, fake_bf16], "D")
    assert jnp.allclose(d16_loss, d16_ref, rtol=1e-4, atol=1e-4), (d16_loss, d16_ref)

    print("KERNEL_OK")
</pallas_src>

<mosaic_0001>
module attributes {stable_mosaic.version = 11 : i64} {
  func.func @kernel(%arg0: i32, %arg1: i32, %arg2: memref<16x128xf32, #tpu.memory_space<vmem>>, %arg3: memref<16x128xf32, #tpu.memory_space<vmem>>, %arg4: memref<1x1xf32, #tpu.memory_space<smem>>, %arg5: memref<8x128xf32, #tpu.memory_space<vmem>>) attributes {dimension_semantics = [#tpu.dimension_semantics<parallel>, #tpu.dimension_semantics<arbitrary>], iteration_bounds = array<i64: 1, 1>, scalar_prefetch = 0 : i64, scratch_operands = 1 : i64, tpu.core_type = #tpu.core_type<tc>, window_params = [{transform_indices = @transform_0, window_bounds = array<i64: 16, 128>}, {transform_indices = @transform_1, window_bounds = array<i64: 16, 128>}, {transform_indices = @transform_2, window_bounds = array<i64: 1, 1>}]} {
    %c0_i32 = arith.constant 0 : i32
    %0 = arith.cmpi eq, %arg1, %c0_i32 : i32
    %1 = arith.extui %0 : i1 to i32
    %c0_i32_0 = arith.constant 0 : i32
    %2 = arith.cmpi ne, %1, %c0_i32_0 : i32
    scf.if %2 {
      %cst_15 = arith.constant 0.000000e+00 : f32
      %32 = vector.broadcast %cst_15 : f32 to vector<8x128xf32>
      %c0_16 = arith.constant 0 : index
      %c0_17 = arith.constant 0 : index
      %33 = vector.load %arg5[%c0_16, %c0_17] : memref<8x128xf32, #tpu.memory_space<vmem>>, vector<8x128xf32>
      tpu.vector_store %arg5[%c0_16, %c0_17], %32 {strides = array<i32>} : memref<8x128xf32, #tpu.memory_space<vmem>>, vector<8x128xf32>,
    } else {
    }
    %c0 = arith.constant 0 : index
    %c0_1 = arith.constant 0 : index
    %3 = vector.load %arg2[%c0, %c0_1] : memref<16x128xf32, #tpu.memory_space<vmem>>, vector<16x128xf32>
    %cst = arith.constant 0.000000e+00 : f32
    %4 = vector.broadcast %cst : f32 to vector<16x128xf32>
    %5 = arith.subf %4, %3 : vector<16x128xf32>
    %cst_2 = arith.constant 0.000000e+00 : f32
    %6 = vector.broadcast %cst_2 : f32 to vector<16x128xf32>
    %7 = arith.maximumf %5, %6 : vector<16x128xf32>
    %8 = math.absf %5 : vector<16x128xf32>
    %cst_3 = arith.constant 0.000000e+00 : f32
    %9 = vector.broadcast %cst_3 : f32 to vector<16x128xf32>
    %10 = arith.subf %9, %8 : vector<16x128xf32>
    %11 = math.exp %10 : vector<16x128xf32>
    %12 = math.log1p %11 : vector<16x128xf32>
    %13 = arith.addf %7, %12 : vector<16x128xf32>
    %c0_4 = arith.constant 0 : index
    %c0_5 = arith.constant 0 : index
    %14 = vector.load %arg3[%c0_4, %c0_5] : memref<16x128xf32, #tpu.memory_space<vmem>>, vector<16x128xf32>
    %cst_6 = arith.constant 0.000000e+00 : f32
    %15 = vector.broadcast %cst_6 : f32 to vector<16x128xf32>
    %16 = arith.maximumf %14, %15 : vector<16x128xf32>
    %17 = math.absf %14 : vector<16x128xf32>
    %cst_7 = arith.constant 0.000000e+00 : f32
    %18 = vector.broadcast %cst_7 : f32 to vector<16x128xf32>
    %19 = arith.subf %18, %17 : vector<16x128xf32>
    %20 = math.exp %19 : vector<16x128xf32>
    %21 = math.log1p %20 : vector<16x128xf32>
    %22 = arith.addf %16, %21 : vector<16x128xf32>
    %23 = arith.addf %13, %22 : vector<16x128xf32>
    %c0_8 = arith.constant 0 : index
    %c0_9 = arith.constant 0 : index
    %24 = vector.load %arg5[%c0_8, %c0_9] : memref<8x128xf32, #tpu.memory_space<vmem>>, vector<8x128xf32>
    %25 = vector.shape_cast %23 : vector<16x128xf32> to vector<2x8x128xf32>
    %cst_10 = arith.constant dense<0.000000e+00> : vector<8x128xf32>
    %26 = vector.multi_reduction <add>, %25, %cst_10 [0] : vector<2x8x128xf32> to vector<8x128xf32>
    %27 = arith.addf %24, %26 : vector<8x128xf32>
    %c0_11 = arith.constant 0 : index
    %c0_12 = arith.constant 0 : index
    %28 = vector.load %arg5[%c0_11, %c0_12] : memref<8x128xf32, #tpu.memory_space<vmem>>, vector<8x128xf32>
    tpu.vector_store %arg5[%c0_11, %c0_12], %27 {strides = array<i32>} : memref<8x128xf32, #tpu.memory_space<vmem>>, vector<8x128xf32>,
    %c0_i32_13 = arith.constant 0 : i32
    %29 = arith.cmpi eq, %arg1, %c0_i32_13 : i32
    %30 = arith.extui %29 : i1 to i32
    %c0_i32_14 = arith.constant 0 : i32
    %31 = arith.cmpi ne, %30, %c0_i32_14 : i32
    scf.if %31 {
      %c0_15 = arith.constant 0 : index
      %c0_16 = arith.constant 0 : index
      %32 = vector.load %arg5[%c0_15, %c0_16] : memref<8x128xf32, #tpu.memory_space<vmem>>, vector<8x128xf32>
      %33 = vector.shape_cast %32 : vector<8x128xf32> to vector<1x8x128xf32>
      %cst_17 = arith.constant dense<0.000000e+00> : vector<1xf32>
      %34 = vector.multi_reduction <add>, %33, %cst_17 [1, 2] : vector<1x8x128xf32> to vector<1xf32>
      %35 = vector.shape_cast %34 : vector<1xf32> to vector<1x1x1xf32>
      %36 = vector.extract %35[0, 0, 0] : f32 from vector<1x1x1xf32>
      %c0_18 = arith.constant 0 : index
      %c0_19 = arith.constant 0 : index
      %37 = memref.load %arg4[%c0_18, %c0_19] : memref<1x1xf32, #tpu.memory_space<smem>>
      memref.store %36, %arg4[%c0_18, %c0_19] : memref<1x1xf32, #tpu.memory_space<smem>>
    } else {
    }
    return
  }
  func.func @transform_0(%arg0: i32, %arg1: i32) -> (i32, i32) {
    %c1_i32 = arith.constant 1 : i32
    %0 = arith.muli %arg0, %c1_i32 : i32
    %1 = arith.addi %0, %arg1 : i32
    %c0_i32 = arith.constant 0 : i32
    %c0_i32_0 = arith.constant 0 : i32
    return %1, %c0_i32 : i32, i32
  }
  func.func @transform_1(%arg0: i32, %arg1: i32) -> (i32, i32) {
    %c1_i32 = arith.constant 1 : i32
    %0 = arith.muli %arg0, %c1_i32 : i32
    %1 = arith.addi %0, %arg1 : i32
    %c0_i32 = arith.constant 0 : i32
    %c0_i32_0 = arith.constant 0 : i32
    return %1, %c0_i32 : i32, i32
  }
  func.func @transform_2(%arg0: i32, %arg1: i32) -> (i32, i32) {
    %c0_i32 = arith.constant 0 : i32
    %c0_i32_0 = arith.constant 0 : i32
    return %arg0, %c0_i32 : i32, i32
  }
}

</mosaic_0001>

<bundles_post_ra>
// kernel: tpu_custom_call.1
= control target key start
LH: loop header
LB: loop body
LE: loop exit
PB: predicated region body
PF: predicated region fallthrough
CT: control target
= control target key end

     0   :  { %7 = vsyncpa [#allocation4], 0  ;;  %s279_s0 = inlined_call_operand.hbm [shape: f32[16,128], index: 0, kind: input, shape index: {}]   ;;  %s280_s1 = inlined_call_operand.hbm [shape: f32[16,128], index: 1, kind: input, shape index: {}]   ;;  %s281_s2 = inlined_call_operand.hbm [shape: f32[1,1], index: 2, kind: output, shape index: {}]  }
   0x1   :  { %8 = vsyncpa [#allocation7], 0 }
   0x2   :  { %9 = vsyncpa [#allocation5], 0  ;;  %s236_s9 = smov [#allocation3]  }
   0x3   :  { %s19_s10 = sshll.u32 %s236_s9, 4  ;;  %s20_s10 = int_to_ptr.vmem [resolvable:$true] %s19_s10 }
   0x4   :  { %s190_s11 = scalar_lea.vmem %s20_s10, 256  ;;  %p195_p1 = scmp.lt.s32.totalorder %s20_s10, %s20_s10 }
   0x5   :  { %p191_p0 = scmp.ne.s32.totalorder %s20_s10, %s190_s11  ;;  %p196_p2 = scmp.lt.s32.totalorder %s190_s11, %s190_s11 }
   0x7   :  { %p197_p3 = por %p196_p2, %p195_p1 }
   0x9   :  { %p198_p4 = pnand %p197_p3, %p191_p0 }
   0xb   :  { %201 = shalt.err (!%p198_p4)
}
   0xc   :  { %s237_s12 = smov 128   ;;  %s238_s13 = smov 8  }
   0xd   :  { %25 = dma.hbm_to_vmem [thread:$0]  %s279_s0, 256, %s20_s10, [#allocation4], %s237_s12, %s237_s12, %s238_s13  }
   0xe   :  { %s239_s16 = smov [#allocation6]  }
   0xf   :  { %s35_s17 = sshll.u32 %s239_s16, 4  ;;  %s36_s17 = int_to_ptr.vmem [resolvable:$true] %s35_s17 }
  0x10   :  { %s210_s18 = scalar_lea.vmem %s36_s17, 256  ;;  %p215_p6 = scmp.lt.s32.totalorder %s36_s17, %s36_s17 }
  0x11   :  { %p211_p5 = scmp.ne.s32.totalorder %s36_s17, %s210_s18  ;;  %p216_p7 = scmp.lt.s32.totalorder %s210_s18, %s210_s18 }
  0x13   :  { %p217_p8 = por %p216_p7, %p215_p6 }
  0x15   :  { %p218_p9 = pnand %p217_p8, %p211_p5 }
  0x17   :  { %221 = shalt.err (!%p218_p9)
}
  0x18   :  { %41 = dma.hbm_to_vmem [thread:$0]  %s280_s1, 256, %s36_s17, [#allocation7], %s237_s12, %s237_s12, %s238_s13  }
  0x19   :  { %230 = dma.done.wait [#allocation4], 256  }
  0x1a   :  { %231 = vsyncadd [#allocation4], 4294967040 }
  0x1b   :  { %232 = dma.done.wait [#allocation7], 256  }
  0x1c   :  { %233 = vsyncadd [#allocation7], 4294967040  ;;  %v57_v0 = vld [vmem:[#allocation3] sm:$0xff]  ;;  %v58_v1 = vld [vmem:[#allocation3 + $0x8] sm:$0xff]  ;;  %s240_s1 = smov [#allocation8]  }
  0x1d   :  { %v262_v2 = vld [vmem:[#allocation6] sm:$0xff]  ;;  %v59_v3 = vsub.f32 0.0, %v57_v0  ;;  %v60_v4 = vsub.f32 0.0, %v58_v1  ;;  %v264_v5 = vld [vmem:[#allocation6 + $0x8] sm:$0xff] }
  0x1e   :  { %v95_v6 = vand.u32 2147483647, %v262_v2  ;;  %v96_v7 = vand.u32 2147483647, %v264_v5  ;;  %v93_v36 = vmax.f32 %v262_v2, 0.0  ;;  %v94_v53 = vmax.f32 %v264_v5, 0.0 }
  0x1f   :  { %v63_v8 = vand.u32 2147483647, %v59_v3  ;;  %v64_v9 = vand.u32 2147483647, %v60_v4  ;;  %v61_v39 = vmax.f32 %v59_v3, 0.0  ;;  %v62_v49 = vmax.f32 %v60_v4, 0.0 }
  0x20   :  { %v97_v10 = vsub.f32 0.0, %v95_v6  ;;  %v98_v11 = vsub.f32 0.0, %v96_v7 }
  0x21   :  { %v65_v12 = vsub.f32 0.0, %v63_v8  ;;  %v66_v13 = vsub.f32 0.0, %v64_v9 }
  0x22   :  { %v99_v14 = vmul.f32 1.442695, %v97_v10  ;;  %v101_v17 = vmul.f32 1.442695, %v98_v11 }
  0x23   :  { %v67_v15 = vmul.f32 1.442695, %v65_v12  ;;  %v69_v16 = vmul.f32 1.442695, %v66_v13 }
  0x24   :  { %166 = vpow2.f32 %v99_v14 }
  0x25   :  { %168 = vpow2.f32 %v67_v15 }
  0x26   :  { %170 = vpow2.f32 %v69_v16 }
  0x27   :  { %172 = vpow2.f32 %v101_v17 }
  0x31   :  { %v167_v18 = vpop.eup %166 }
  0x32   :  { %v169_v19 = vpop.eup %168  ;;  %v103_v20 = vadd.f32 1.0, %v167_v18  ;;  %v106_v26 = vmul.f32 -0.5, %v167_v18  ;;  %v109_v31 = vand.u32 2147483647, %v167_v18 }
  0x33   :  { %v171_v21 = vpop.eup %170  ;;  %v71_v22 = vadd.f32 1.0, %v169_v19  ;;  %v74_v27 = vmul.f32 -0.5, %v169_v19  ;;  %v77_v33 = vand.u32 2147483647, %v169_v19 }
  0x34   :  { %v173_v23 = vpop.eup %172  ;;  %v80_v24 = vadd.f32 1.0, %v171_v21  ;;  %174 = vlog2.f32 %v103_v20  ;;  %v83_v28 = vmul.f32 -0.5, %v171_v21  ;;  %v107_v29 = vadd.f32 1.0, %v106_v26 }
  0x35   :  { %176 = vlog2.f32 %v71_v22  ;;  %v112_v25 = vadd.f32 1.0, %v173_v23  ;;  %v75_v30 = vadd.f32 1.0, %v74_v27  ;;  %v115_v32 = vmul.f32 -0.5, %v173_v23 }
  0x36   :  { %178 = vlog2.f32 %v80_v24  ;;  %v84_v34 = vadd.f32 1.0, %v83_v28  ;;  %v86_v35 = vand.u32 2147483647, %v171_v21  ;;  %v108_v37 = vmul.f32 %v167_v18, %v107_v29 }
  0x37   :  { %180 = vlog2.f32 %v112_v25  ;;  %v76_v40 = vmul.f32 %v169_v19, %v75_v30  ;;  %vm269_vm0 = vcmp.lt.f32.partialorder %v109_v31, 0.0004427343  ;;  %v116_v42 = vadd.f32 1.0, %v115_v32 }
  0x38   :  { %vm78_vm1 = vcmp.lt.f32.partialorder %v77_v33, 0.0004427343  ;;  %v85_v44 = vmul.f32 %v171_v21, %v84_v34  ;;  %v118_v46 = vand.u32 2147483647, %v173_v23  ;;  %vm87_vm2 = vcmp.lt.f32.partialorder %v86_v35, 0.0004427343 }
  0x39   :  { %v117_v54 = vmul.f32 %v173_v23, %v116_v42 }
  0x3a   :  { %vm119_vm3 = vcmp.lt.f32.partialorder %v118_v46, 0.0004427343 }
  0x41   :  { %v175_v38 = vpop.eup %174 }
  0x42   :  { %v177_v43 = vpop.eup %176  ;;  %v105_v45 = vmul.f32 0.6931472, %v175_v38 }
  0x43   :  { %v179_v47 = vpop.eup %178  ;;  %v73_v48 = vmul.f32 0.6931472, %v177_v43 }
  0x44   :  { %v82_v50 = vmul.f32 0.6931472, %v179_v47  ;;  %v111_v51 = vsel %vm269_vm0, %v108_v37, %v105_v45  ;;  %v181_v55 = vpop.eup %180 }
  0x45   :  { %v79_v52 = vsel %vm78_vm1, %v76_v40, %v73_v48  ;;  %v121_v58 = vadd.f32 %v111_v51, %v93_v36  ;;  %v114_v59 = vmul.f32 0.6931472, %v181_v55 }
  0x46   :  { %v88_v56 = vsel %vm87_vm2, %v85_v44, %v82_v50  ;;  %v89_v57 = vadd.f32 %v79_v52, %v61_v39 }
  0x47   :  { %v90_v60 = vadd.f32 %v88_v56, %v62_v49  ;;  %v120_v61 = vsel %vm119_vm3, %v117_v54, %v114_v59 }
  0x48   :  { %v122_v62 = vadd.f32 %v120_v61, %v94_v53  ;;  %v123_v63 = vadd.f32 %v121_v58, %v89_v57 }
  0x4a   :  { %v124_v0 = vadd.f32 %v122_v62, %v90_v60 }
  0x4c   :  { %v126_v1 = vadd.f32 %v124_v0, %v123_v63 }
  0x4e   :  { %133 = vadd.xlane.f32.xlu0 %v126_v1 }
  0xd7   :  { %v134_v2 = vpop.xlane.xlu0 %133 }
  0xd8   :  { %v135_v3 = vrot.slane %v134_v2, 4 }
  0xda   :  { %v136_v4 = vadd.f32 %v135_v3, %v134_v2 }
  0xdc   :  { %v137_v6 = vrot.slane %v136_v4, 2 }
  0xde   :  { %v138_v7 = vadd.f32 %v137_v6, %v136_v4 }
  0xe0   :  { %v139_v5 = vrot.slane %v138_v7, 1 }
  0xe2   :  { %v140_v8 = vadd.f32 %v139_v5, %v138_v7 }
  0xe4   :  { %159 = vpush %v140_v8 }
 0x115   :  { %s160_s0 = spop %159 }
 0x116   :  { %143 = sst [smem:[#allocation8]] %s160_s0 }
 0x117   :  { %151 = dma.smem_to_hbm %s240_s1, 16, %s281_s2, [#allocation5]  }
 0x118   :  { %234 = dma.done.wait [#allocation5], 16  }
 0x119   :  { %235 = vsyncadd [#allocation5], 4294967280 }
 0x11a   :  { %155 = sfence }
 0x11b   :  { %156 = vsyncpa [#allocation4], 1 }
 0x11c   :  { %157 = vsyncpa [#allocation7], 1 }
 0x11d   :  { %158 = vsyncpa [#allocation5], 1 }

</bundles_post_ra>
